<compile_context>
chip_gen: v5e
topology: v5e:2x2
jax: 0.10.0
libtpu: 0.0.40
codegen_flags: <defaults>
</compile_context>

<pallas_src>
import functools

import jax
import jax.numpy as jnp
from jax.experimental import pallas as pl
from jax.experimental.pallas import tpu as pltpu

LANE = 128
SUBLANE = 8
MAX_BLOCK_B = 256     # batch rows per grid step at scale (review: >=128/256)
_NEG_INF = -1e30      # bias for padded softmax columns -> exp() underflows to 0


def _round_up(x, m):
    return (x + m - 1) // m * m


def _mlp_softmax_kernel(s_ref, a_ref, w1_ref, b1_ref, w2_ref, b2_ref, o_ref):
    """Fused two-hot build + 2-layer MLP + softmax for one batch tile.

    s_ref, a_ref : (BLOCK_B, 1) int32   (a_ref already offset by state_dim)
    w1_ref       : (d_in_pad, h_pad)    f32, resident across grid steps
    b1_ref       : (1, h_pad)           f32
    w2_ref       : (h_pad, d_out_pad)   f32, resident across grid steps
    b2_ref       : (1, d_out_pad)       f32, padded cols biased to -1e30
    o_ref        : (BLOCK_B, d_out_pad) f32
    """
    block_b = o_ref.shape[0]
    d_in_pad = w1_ref.shape[0]

    # Two-hot input row built on the VPU (replaces one_hot + concat + gather).
    col = jax.lax.broadcasted_iota(jnp.int32, (block_b, d_in_pad), 1)
    x = ((col == s_ref[...]) | (col == a_ref[...])).astype(jnp.float32)

    # Layer 1 on the MXU, bias + ReLU on the VPU; h stays in vregs.
    h = jnp.maximum(
        jnp.dot(x, w1_ref[...], preferred_element_type=jnp.float32)
        + b1_ref[...], 0.0)

    # Layer 2 on the MXU; padded softmax columns carry a -1e30 bias -> ~0 prob.
    logits = jnp.dot(h, w2_ref[...],
                     preferred_element_type=jnp.float32) + b2_ref[...]

    m = jnp.max(logits, axis=-1, keepdims=True)
    e = jnp.exp(logits - m)
    # Exact division (the reciprocal is nowhere near the bottleneck).
    o_ref[...] = (e / jnp.sum(e, axis=-1, keepdims=True)).astype(o_ref.dtype)


@functools.partial(jax.jit, static_argnames=("out_dim",))
def mlp_forward(s_idx, a_off, w1p, b1p, w2p, b2p, *, out_dim):
    """Fused two-hot + MLP + softmax on padded weights. Returns (B, out_dim)."""
    B = s_idx.shape[0]
    d_in_pad, h_pad = w1p.shape
    d_out_pad = w2p.shape[1]

    # Large tile at scale (feeds the MXU with M=256), clipped for tiny batches.
    block_b = min(MAX_BLOCK_B, _round_up(max(B, 1), SUBLANE))
    b_pad = _round_up(max(B, 1), block_b)
    if b_pad != B:
        # dummy (valid) indices for padded rows; rows are sliced off below
        s_idx = jnp.pad(s_idx, (0, b_pad - B))
        a_off = jnp.pad(a_off, (0, b_pad - B))
    s2 = s_idx.reshape(b_pad, 1)
    a2 = a_off.reshape(b_pad, 1)

    out = pl.pallas_call(
        _mlp_softmax_kernel,
        out_shape=jax.ShapeDtypeStruct((b_pad, d_out_pad), jnp.float32),
        grid_spec=pltpu.PrefetchScalarGridSpec(
            num_scalar_prefetch=0,
            grid=(b_pad // block_b,),
            in_specs=[
                # per-tile index columns
                pl.BlockSpec((block_b, 1), lambda i: (i, 0)),
                pl.BlockSpec((block_b, 1), lambda i: (i, 0)),
                # whole-array weight blocks: resident in VMEM across grid steps
                pl.BlockSpec((d_in_pad, h_pad), lambda i: (0, 0)),
                pl.BlockSpec((1, h_pad), lambda i: (0, 0)),
                pl.BlockSpec((h_pad, d_out_pad), lambda i: (0, 0)),
                pl.BlockSpec((1, d_out_pad), lambda i: (0, 0)),
            ],
            out_specs=pl.BlockSpec((block_b, d_out_pad), lambda i: (i, 0)),
        ),
        compiler_params=pltpu.CompilerParams(
            dimension_semantics=("parallel",)),
    )(s2, a2, w1p, b1p, w2p, b2p)
    # drop batch/lane padding (tiny slice, outside the kernel)
    return out[:B, :out_dim]


def pad_params(w1, b1, w2, b2):
    """One-time padding of weights (outside the hot path).

    * input dim (state_dim+action_dim) -> multiple of 8 (sublane-aligned K)
    * hidden / output dims -> multiples of 128 (lane-dense; use 256 when
      scaling up on v6e/v7x)
    * padded softmax (output) columns get a -1e30 bias -> ~0 probability,
      so the real columns are exactly the softmax over the unpadded logits.
    """
    d_in, h = w1.shape
    d_out = w2.shape[1]
    d_in_pad = _round_up(d_in, SUBLANE)
    h_pad = _round_up(h, LANE)
    d_out_pad = _round_up(d_out, LANE)
    w1p = jnp.pad(w1, ((0, d_in_pad - d_in), (0, h_pad - h)))
    b1p = jnp.pad(b1, ((0, 0), (0, h_pad - h)))
    w2p = jnp.pad(w2, ((0, h_pad - h), (0, d_out_pad - d_out)))
    b2p = jnp.pad(b2, ((0, 0), (0, d_out_pad - d_out)),
                  constant_values=_NEG_INF)
    return w1p, b1p, w2p, b2p


def neural_network_state_model_forward(s_idx, a_idx, padded_params, state_dim):
    """Equivalent of NeuralNetworkStateModel.forward (discrete state/action)."""
    w1p, b1p, w2p, b2p = padded_params
    s_idx = s_idx.astype(jnp.int32)
    a_off = a_idx.astype(jnp.int32) + state_dim   # action one-hot column offset
    return mlp_forward(s_idx, a_off, w1p, b1p, w2p, b2p,
                       out_dim=state_dim)


def init_params(key, layer_sizes):
    """Deterministic init matching nn.Linear shapes (stored transposed: [in, out])."""
    params = []
    for i in range(len(layer_sizes) - 1):
        fan_in, fan_out = layer_sizes[i], layer_sizes[i + 1]
        key, kw, kb = jax.random.split(key, 3)
        bound = 1.0 / jnp.sqrt(jnp.float32(fan_in))
        w = jax.random.uniform(kw, (fan_in, fan_out), jnp.float32, -bound, bound)
        b = jax.random.uniform(kb, (1, fan_out), jnp.float32, -bound, bound)
        params += [w, b]
    return tuple(params)


# TODO(synk): fit()/predict()/save()/load() (Adam training loop, numpy random
# sampling, pickling) are host-side logic with no Pallas equivalent; only the
# forward pass is implemented here.

if __name__ == "__main__":
    # layer_sizes[0] must equal state_dim + action_dim for the concat to feed
    # the first Linear (the torch default [1,32,1] only works when
    # state_dim + action_dim == 1; we pick a runnable configuration).
    state_dim = 16
    action_dim = 4
    hidden = 32
    batch = 8
    layer_sizes = [state_dim + action_dim, hidden, state_dim]

    key = jax.random.PRNGKey(0)
    k_params, k_s, k_a = jax.random.split(key, 3)
    params = init_params(k_params, layer_sizes)
    padded_params = pad_params(*params)     # done once, outside the hot path

    s_idx = jax.random.randint(k_s, (batch,), 0, state_dim, dtype=jnp.int32)
    a_idx = jax.random.randint(k_a, (batch,), 0, action_dim, dtype=jnp.int32)

    out = neural_network_state_model_forward(s_idx, a_idx, padded_params, state_dim)
    out = jax.block_until_ready(out)

    # sanity: softmax rows sum to 1 (exact division in the kernel now)
    assert out.shape == (batch, state_dim)
    assert jnp.allclose(jnp.sum(out, axis=1), 1.0, atol=1e-3)

    # reference check in plain JAX (original one_hot + concat + MLP + softmax)
    w1, b1, w2, b2 = params
    s_oh = jax.nn.one_hot(s_idx, state_dim, dtype=jnp.float32)
    a_oh = jax.nn.one_hot(a_idx, action_dim, dtype=jnp.float32)
    x = jnp.concatenate([s_oh, a_oh], axis=1)
    ref = jax.nn.softmax(jnp.maximum(x @ w1 + b1, 0.0) @ w2 + b2, axis=1)
    assert jnp.allclose(out, ref, atol=1e-3)

    print("KERNEL_OK")
</pallas_src>

<mosaic_0001>
module attributes {stable_mosaic.version = 11 : i64} {
  func.func @_mlp_softmax_kernel(%arg0: i32, %arg1: memref<8x1xi32, #tpu.memory_space<vmem>>, %arg2: memref<8x1xi32, #tpu.memory_space<vmem>>, %arg3: memref<24x128xf32, #tpu.memory_space<vmem>>, %arg4: memref<1x128xf32, #tpu.memory_space<vmem>>, %arg5: memref<128x128xf32, #tpu.memory_space<vmem>>, %arg6: memref<1x128xf32, #tpu.memory_space<vmem>>, %arg7: memref<8x128xf32, #tpu.memory_space<vmem>>) attributes {dimension_semantics = [#tpu.dimension_semantics<parallel>], iteration_bounds = array<i64: 1>, scalar_prefetch = 0 : i64, scratch_operands = 0 : i64, tpu.core_type = #tpu.core_type<tc>, window_params = [{transform_indices = @transform_0, window_bounds = array<i64: 8, 1>}, {transform_indices = @transform_1, window_bounds = array<i64: 8, 1>}, {pipeline_mode = #tpu.pipeline_mode<synchronous>, transform_indices = @transform_2, window_bounds = array<i64: 24, 128>}, {pipeline_mode = #tpu.pipeline_mode<synchronous>, transform_indices = @transform_3, window_bounds = array<i64: 1, 128>}, {pipeline_mode = #tpu.pipeline_mode<synchronous>, transform_indices = @transform_4, window_bounds = array<i64: 128, 128>}, {pipeline_mode = #tpu.pipeline_mode<synchronous>, transform_indices = @transform_5, window_bounds = array<i64: 1, 128>}, {transform_indices = @transform_6, window_bounds = array<i64: 8, 128>}]} {
    %0 = tpu.iota {dimensions = array<i32: 1>} : vector<8x24xi32>
    %c0 = arith.constant 0 : index
    %c0_0 = arith.constant 0 : index
    %1 = vector.load %arg1[%c0, %c0_0] : memref<8x1xi32, #tpu.memory_space<vmem>>, vector<8x1xi32>
    %2 = vector.broadcast %1 : vector<8x1xi32> to vector<8x24xi32>
    %3 = arith.cmpi eq, %0, %2 : vector<8x24xi32>
    %c0_1 = arith.constant 0 : index
    %c0_2 = arith.constant 0 : index
    %4 = vector.load %arg2[%c0_1, %c0_2] : memref<8x1xi32, #tpu.memory_space<vmem>>, vector<8x1xi32>
    %5 = vector.broadcast %4 : vector<8x1xi32> to vector<8x24xi32>
    %6 = arith.cmpi eq, %0, %5 : vector<8x24xi32>
    %7 = arith.ori %3, %6 : vector<8x24xi1>
    %8 = arith.extui %7 : vector<8x24xi1> to vector<8x24xi32>
    %9 = arith.sitofp %8 : vector<8x24xi32> to vector<8x24xf32>
    %c0_3 = arith.constant 0 : index
    %c0_4 = arith.constant 0 : index
    %10 = vector.load %arg3[%c0_3, %c0_4] : memref<24x128xf32, #tpu.memory_space<vmem>>, vector<24x128xf32>
    %cst = arith.constant dense<0.000000e+00> : vector<8x128xf32>
    %11 = tpu.matmul %9, %10, %cst {dimension_numbers = #tpu.dot_dimension_numbers<[1], [0], [0], [1], [0, 0, 1, 1], [], []>} : vector<8x24xf32>, vector<24x128xf32>, vector<8x128xf32> -> vector<8x128xf32>
    %c0_5 = arith.constant 0 : index
    %c0_6 = arith.constant 0 : index
    %12 = vector.load %arg4[%c0_5, %c0_6] : memref<1x128xf32, #tpu.memory_space<vmem>>, vector<1x128xf32>
    %13 = vector.broadcast %12 : vector<1x128xf32> to vector<8x128xf32>
    %14 = arith.addf %11, %13 : vector<8x128xf32>
    %cst_7 = arith.constant 0.000000e+00 : f32
    %15 = vector.broadcast %cst_7 : f32 to vector<8x128xf32>
    %16 = arith.maximumf %14, %15 : vector<8x128xf32>
    %c0_8 = arith.constant 0 : index
    %c0_9 = arith.constant 0 : index
    %17 = vector.load %arg5[%c0_8, %c0_9] : memref<128x128xf32, #tpu.memory_space<vmem>>, vector<128x128xf32>
    %cst_10 = arith.constant dense<0.000000e+00> : vector<8x128xf32>
    %18 = tpu.matmul %16, %17, %cst_10 {dimension_numbers = #tpu.dot_dimension_numbers<[1], [0], [0], [1], [0, 0, 1, 1], [], []>} : vector<8x128xf32>, vector<128x128xf32>, vector<8x128xf32> -> vector<8x128xf32>
    %c0_11 = arith.constant 0 : index
    %c0_12 = arith.constant 0 : index
    %19 = vector.load %arg6[%c0_11, %c0_12] : memref<1x128xf32, #tpu.memory_space<vmem>>, vector<1x128xf32>
    %20 = vector.broadcast %19 : vector<1x128xf32> to vector<8x128xf32>
    %21 = arith.addf %18, %20 : vector<8x128xf32>
    %cst_13 = arith.constant dense<0xFF800000> : vector<8xf32>
    %22 = vector.multi_reduction <maximumf>, %21, %cst_13 [1] : vector<8x128xf32> to vector<8xf32>
    %23 = vector.shape_cast %22 : vector<8xf32> to vector<8x1xf32>
    %24 = vector.broadcast %23 : vector<8x1xf32> to vector<8x128xf32>
    %25 = arith.subf %21, %24 : vector<8x128xf32>
    %26 = math.exp %25 : vector<8x128xf32>
    %cst_14 = arith.constant dense<0.000000e+00> : vector<8xf32>
    %27 = vector.multi_reduction <add>, %26, %cst_14 [1] : vector<8x128xf32> to vector<8xf32>
    %28 = vector.shape_cast %27 : vector<8xf32> to vector<8x1xf32>
    %29 = vector.broadcast %28 : vector<8x1xf32> to vector<8x128xf32>
    %30 = arith.divf %26, %29 : vector<8x128xf32>
    %c0_15 = arith.constant 0 : index
    %c0_16 = arith.constant 0 : index
    %31 = vector.load %arg7[%c0_15, %c0_16] : memref<8x128xf32, #tpu.memory_space<vmem>>, vector<8x128xf32>
    tpu.vector_store %arg7[%c0_15, %c0_16], %30 {strides = array<i32>} : memref<8x128xf32, #tpu.memory_space<vmem>>, vector<8x128xf32>,
    return
  }
  func.func @transform_0(%arg0: i32) -> (i32, i32) {
    %c0_i32 = arith.constant 0 : i32
    %c0_i32_0 = arith.constant 0 : i32
    return %arg0, %c0_i32 : i32, i32
  }
  func.func @transform_1(%arg0: i32) -> (i32, i32) {
    %c0_i32 = arith.constant 0 : i32
    %c0_i32_0 = arith.constant 0 : i32
    return %arg0, %c0_i32 : i32, i32
  }
  func.func @transform_2(%arg0: i32) -> (i32, i32) {
    %c0_i32 = arith.constant 0 : i32
    %c0_i32_0 = arith.constant 0 : i32
    %c0_i32_1 = arith.constant 0 : i32
    return %c0_i32, %c0_i32_0 : i32, i32
  }
  func.func @transform_3(%arg0: i32) -> (i32, i32) {
    %c0_i32 = arith.constant 0 : i32
    %c0_i32_0 = arith.constant 0 : i32
    %c0_i32_1 = arith.constant 0 : i32
    return %c0_i32, %c0_i32_0 : i32, i32
  }
  func.func @transform_4(%arg0: i32) -> (i32, i32) {
    %c0_i32 = arith.constant 0 : i32
    %c0_i32_0 = arith.constant 0 : i32
    %c0_i32_1 = arith.constant 0 : i32
    return %c0_i32, %c0_i32_0 : i32, i32
  }
  func.func @transform_5(%arg0: i32) -> (i32, i32) {
    %c0_i32 = arith.constant 0 : i32
    %c0_i32_0 = arith.constant 0 : i32
    %c0_i32_1 = arith.constant 0 : i32
    return %c0_i32, %c0_i32_0 : i32, i32
  }
  func.func @transform_6(%arg0: i32) -> (i32, i32) {
    %c0_i32 = arith.constant 0 : i32
    %c0_i32_0 = arith.constant 0 : i32
    return %arg0, %c0_i32 : i32, i32
  }
}

</mosaic_0001>

<bundles_post_ra>
// kernel: mlp_forward.1
= control target key start
LH: loop header
LB: loop body
LE: loop exit
PB: predicated region body
PF: predicated region fallthrough
CT: control target
= control target key end

     0   :  { %11 = vsyncpa [#allocation3], 0  ;;  %s341_s0 = inlined_call_operand.vmem [shape: s32[8,1], index: 0, kind: input, shape index: {}]   ;;  %s342_s1 = inlined_call_operand.vmem [shape: s32[8,1], index: 1, kind: input, shape index: {}]   ;;  %s343_s2 = inlined_call_operand.hbm [shape: f32[24,128], index: 2, kind: input, shape index: {}]   ;;  %s344_s3 = inlined_call_operand.vmem [shape: f32[1,128], index: 3, kind: input, shape index: {}]   ;;  %s345_s4 = inlined_call_operand.hbm [shape: f32[128,128], index: 4, kind: input, shape index: {}]   ;;  %s346_s5 = inlined_call_operand.vmem [shape: f32[1,128], index: 5, kind: input, shape index: {}]   ;;  %s347_s6 = inlined_call_operand.hbm [shape: f32[8,128], index: 6, kind: output, shape index: {}]  }
   0x1   :  { %12 = vsyncpa [#allocation6], 0 }
   0x2   :  { %13 = vsyncpa [#allocation4], 0  ;;  %s22_s23 = sshll.u32 %s343_s2, 4  ;;  %s278_s24 = smov [#allocation2]   ;;  %s23_s23 = int_to_ptr.hbm [resolvable:$true] %s22_s23 }
   0x3   :  { %s24_s25 = sshll.u32 %s278_s24, 4  ;;  %s37_s28 = sshll.u32 %s345_s4, 4  ;;  %s25_s25 = int_to_ptr.vmem [resolvable:$true] %s24_s25  ;;  %s38_s28 = int_to_ptr.hbm [resolvable:$true] %s37_s28 }
   0x4   :  { %s279_s29 = smov 128   ;;  %s280_s30 = smov 8  }
   0x5   :  { %30 = dma.hbm_to_vmem [thread:$0]  %s23_s23, 384, %s25_s25, [#allocation3], %s279_s29, %s279_s29, %s280_s30  }
   0x6   :  { %s281_s7 = smov [#allocation5]  }
   0x7   :  { %s39_s8 = sshll.u32 %s281_s7, 4  ;;  %s40_s8 = int_to_ptr.vmem [resolvable:$true] %s39_s8 }
   0x8   :  { %45 = dma.hbm_to_vmem [thread:$0]  %s38_s28, 2048, %s40_s8, [#allocation6], %s279_s29, %s279_s29, %s280_s30  }
   0x9   :  { %272 = dma.done.wait [#allocation3], 384  }
   0xa   :  { %273 = vsyncadd [#allocation3], 4294966912 }
   0xb   :  { %274 = dma.done.wait [#allocation6], 2048  }
   0xc   :  { %275 = vsyncadd [#allocation6], 4294965248  ;;  %v282_v0 = vmov 0   ;;  %v58_v1 = vld [vmem:[%s341_s0] sm:$0xff]  ;;  %v73_v3 = vld [vmem:[#allocation2 + $0x10] sm:$0xff]  ;;  %v56_v19 = vlaneseq  ;;  %vm78_vm2 = vcmask 195584  }
   0xd   :  { %193 = vset.pattern.permute.xlu0 %v282_v0  ;;  %v63_v2 = vld [vmem:[%s342_s1] sm:$0xff]  ;;  %95 = vmatpush.msra.mxu0 %v73_v3  ;;  %v72_v4 = vld [vmem:[#allocation2 + $0x8] sm:$0xff]  ;;  %v118_v6 = vld [vmem:[#allocation5 + $0x78] sm:$0xff]  ;;  %v283_v23 = vmov 0.0   ;;  %s173_s15 = sshll.u32 %s347_s6, 4  ;;  %s174_s15 = int_to_ptr.hbm [resolvable:$true] %s173_s15 }
   0xe   :  { %60 = vperm.xlu0 %193, %v58_v1   ;;  %v71_v5 = vld [vmem:[#allocation2] sm:$0xff]  ;;  %v117_v7 = vld [vmem:[#allocation5 + $0x70] sm:$0xff]  ;;  %123 = vmatpush.msra.mxu1 %v118_v6  ;;  %v115_v9 = vld [vmem:[#allocation5 + $0x60] sm:$0xff]  ;;  %v57_v21 = vand.u32 127, %v56_v19 }
   0xf   :  { %96 = vmatpush.msra.mxu0 %v72_v4  ;;  %v116_v8 = vld [vmem:[#allocation5 + $0x68] sm:$0xff]  ;;  %v114_v10 = vld [vmem:[#allocation5 + $0x58] sm:$0xff]  ;;  %v113_v11 = vld [vmem:[#allocation5 + $0x50] sm:$0xff] }
  0x10   :  { %124 = vmatpush.msra.mxu1 %v117_v7  ;;  %v112_v12 = vld [vmem:[#allocation5 + $0x48] sm:$0xff]  ;;  %v111_v13 = vld [vmem:[#allocation5 + $0x40] sm:$0xff]  ;;  %v110_v14 = vld [vmem:[#allocation5 + $0x38] sm:$0xff] }
  0x11   :  { %97 = vmatpush.msra.mxu0 %v71_v5  ;;  %v109_v15 = vld [vmem:[#allocation5 + $0x30] sm:$0xff]  ;;  %v108_v16 = vld [vmem:[#allocation5 + $0x28] sm:$0xff]  ;;  %v107_v18 = vld [vmem:[#allocation5 + $0x20] sm:$0xff] }
  0x12   :  { %125 = vmatpush.msra.mxu1 %v116_v8  ;;  %v106_v20 = vld [vmem:[#allocation5 + $0x18] sm:$0xff]  ;;  %v105_v25 = vld [vmem:[#allocation5 + $0x10] sm:$0xff]  ;;  %v104_v26 = vld [vmem:[#allocation5 + $0x8] sm:$0xff] }
  0x13   :  { %v103_v27 = vld [vmem:[#allocation5] sm:$0xff]  ;;  %v194_v28 = vld [vmem:[%s344_s3] ss:$0 sm:$0xff]  ;;  %s284_s3 = smov [#allocation7]  }
  0x14   :  { %126 = vmatpush.msra.mxu1 %v115_v9  ;;  %v195_v32 = vld [vmem:[%s346_s5] ss:$0 sm:$0xff]  ;;  %s171_s5 = sshll.u32 %s284_s3, 4  ;;  %s172_s5 = int_to_ptr.vmem [resolvable:$true] %s171_s5 }
  0x16   :  { %65 = vperm.xlu0 %193, %v63_v2   ;;  %127 = vmatpush.msra.mxu1 %v114_v10 }
  0x18   :  { %128 = vmatpush.msra.mxu1 %v113_v11 }
  0x1a   :  { %129 = vmatpush.msra.mxu1 %v112_v12 }
  0x1c   :  { %130 = vmatpush.msra.mxu1 %v111_v13 }
  0x1e   :  { %131 = vmatpush.msra.mxu1 %v110_v14 }
  0x20   :  { %132 = vmatpush.msra.mxu1 %v109_v15 }
  0x22   :  { %133 = vmatpush.msra.mxu1 %v108_v16 }
  0x24   :  { %134 = vmatpush.msra.mxu1 %v107_v18 }
  0x26   :  { %135 = vmatpush.msra.mxu1 %v106_v20 }
  0x28   :  { %136 = vmatpush.msra.mxu1 %v105_v25 }
  0x2a   :  { %137 = vmatpush.msra.mxu1 %v104_v26 }
  0x2c   :  { %138 = vmatpush.msra.mxu1 %v103_v27 }
  0x80   :  { %v61_v17 = vpop.permute.xlu0 %60 }
  0x81   :  { %vm62_vm0 = vcmp.eq.s32.totalorder %v57_v21, %v61_v17 }
  0x88   :  { %v66_v22 = vpop.permute.xlu0 %65 }
  0x89   :  { %vm67_vm1 = vcmp.eq.s32.totalorder %v57_v21, %v66_v22 }
  0x8a   :  { %vm68_vm3 = vmor %vm62_vm0, %vm67_vm1 }
  0x8b   :  { %v184_v24 = vsel %vm68_vm3, 1.0, %v283_v23 }
  0x8c   :  { %185 = vmatmul.msk.f32.vlgmr.msra.gmra.mxu0 %vm78_vm2, %v184_v24 }
 0x109   :  { %v99_v29 = vpop.f32.mrf.mxu0 }
 0x10a   :  { %v100_v30 = vadd.f32 %v194_v28, %v99_v29 }
 0x10c   :  { %v102_v31 = vmax.f32 %v100_v30, 0.0 }
 0x10e   :  { %139 = vmatmul.f32.vlgmr.msra.gmra.mxu1 %v102_v31 }
 0x18b   :  { %v140_v33 = vpop.f32.mrf.mxu1 }
 0x18c   :  { %v141_v34 = vadd.f32 %v195_v32, %v140_v33 }
 0x18e   :  { %143 = vmax.xlane.f32.xlu1 %v141_v34 }
 0x201   :  { %v144_v35 = vpop.xlane.xlu1 %143 }
 0x202   :  { %v145_v36 = vsub.f32 %v141_v34, %v144_v35 }
 0x204   :  { %v146_v37 = vmul.f32 1.442695, %v145_v36 }
 0x206   :  { %196 = vpow2.f32 %v146_v37 }
 0x20c   :  { %v197_v38 = vpop.eup %196 }
 0x20d   :  { %148 = vadd.xlane.f32.xlu1 %v197_v38 }
 0x280   :  { %v149_v39 = vpop.xlane.xlu1 %148 }
 0x281   :  { %198 = vrcp.f32 %v149_v39  ;;  %v161_v43 = vand.u32 2147483648, %v149_v39  ;;  %v159_v45 = vand.u32 2147483647, %v149_v39  ;;  %vm155_vm5 = vweird.f32 %v149_v39 }
 0x283   :  { %v162_v47 = vor.u32 1.1754944e-38, %v161_v43  ;;  %vm160_vm7 = vcmp.eq.f32.partialorder %v159_v45, 8.507059e+37 }
 0x287   :  { %v199_v40 = vpop.eup %198 }
 0x288   :  { %v151_v41 = vmul.f32 %v199_v40, %v149_v39  ;;  %vm156_vm4 = vweird.f32 %v199_v40 }
 0x289   :  { %vm157_vm6 = vmor %vm155_vm5, %vm156_vm4 }
 0x28a   :  { %v152_v42 = vsub.f32 1.0, %v151_v41 }
 0x28c   :  { %v153_v44 = vmul.f32 %v199_v40, %v152_v42 }
 0x28e   :  { %v154_v46 = vadd.f32 %v199_v40, %v153_v44 }
 0x290   :  { %v158_v48 = vsel %vm157_vm6, %v199_v40, %v154_v46 }
 0x291   :  { %v163_v49 = vsel %vm160_vm7, %v162_v47, %v158_v48 }
 0x292   :  { %v164_v50 = vmul.f32 %v197_v38, %v163_v49 }
 0x294   :  { %165 = vst [vmem:[#allocation7] sm:$0xff] %v164_v50 }
 0x295   :  { %176 = dma.vmem_to_hbm [thread:$0]  %s172_s5, 128, %s174_s15, [#allocation4]  }
 0x296   :  { %276 = dma.done.wait [#allocation4], 128  }
 0x297   :  { %277 = vsyncadd [#allocation4], 4294967168 }
 0x298   :  { %181 = vsyncpa [#allocation3], 1 }
 0x299   :  { %182 = vsyncpa [#allocation6], 1 }
 0x29a   :  { %183 = vsyncpa [#allocation4], 1 }

</bundles_post_ra>
